<compile_context>
chip_gen: v6e
topology: v6e:2x2x1
jax: 0.10.0
libtpu: 0.0.40
codegen_flags: <defaults>
</compile_context>

<pallas_src>
import jax
import jax.numpy as jnp
from jax import lax
from jax.experimental import pallas as pl
from jax.experimental.pallas import tpu as pltpu

SCALES = (0, 1, 2, 3)          # box-blur radii -> kernel sizes 1, 3, 5, 7
_BLUR_RADII = (1, 2, 3)        # non-trivial radii (radius 0 == identity)


def bokeh_kernel(s_ref, x_ref, o_ref):
    """s_ref: SMEM (4,) f32 with s[r] = w[r] / (2r+1)^2 (folded on host).
    x_ref / o_ref: VMEM (NB, CB, H, W) f32 tiles."""
    nb, cb, H, W = x_ref.shape
    x = x_ref[...].reshape(nb * cb, H, W)   # merge leading dims (layout-free)

    # ---- hoisted index planes & masks: built ONCE, reused for every shift ---
    idx_h = lax.broadcasted_iota(jnp.int32, x.shape, 1)
    idx_w = lax.broadcasted_iota(jnp.int32, x.shape, 2)

    def edge_mask(idx, d, n):
        # positions j such that j + d lies in [0, n): a single compare.
        return (idx < n - d) if d > 0 else (idx >= -d)

    mask_h = {d: edge_mask(idx_h, d, H) for r in _BLUR_RADII for d in (-r, r)}
    mask_w = {d: edge_mask(idx_w, d, W) for r in _BLUR_RADII for d in (-r, r)}

    def shifted(v, d, axis, mask, n):
        # out[..., j, ...] = v[..., j + d, ...] with zero fill ("same" zero pad)
        return jnp.where(mask, pltpu.roll(v, shift=(-d) % n, axis=axis), 0.0)

    # radius 0 (identity blur); its blend weight is already folded into s[0].
    acc = s_ref[0] * x

    # Incremental horizontal (lane-axis) box sums shared across scales:
    #   row_r = row_{r-1} + x shifted by +/- r   (6 lane rolls total, not 12)
    row = x
    for r in _BLUR_RADII:
        row = (row
               + shifted(x, -r, 2, mask_w[-r], W)
               + shifted(x, r, 2, mask_w[r], W))
        # vertical (sublane-axis) pass for this radius
        blur = row
        for d in range(1, r + 1):
            blur = (blur
                    + shifted(row, -d, 1, mask_h[-d], H)
                    + shifted(row, d, 1, mask_h[d], H))
        # s[r] = w[r] / (2r+1)^2 -> single fused scale-and-accumulate
        acc = acc + s_ref[r] * blur

    o_ref[...] = acc.reshape(nb, cb, H, W).astype(o_ref.dtype)


def _pick_blocks(N, C, H, W, budget_bytes=1 << 20):
    """Pick (batch, channel) block sizes: large enough to amortize per-step
    overhead, small enough that the ~15x live-temporary footprint stays well
    under the scoped VMEM limit on every generation (v7x: 64 MiB physical)."""
    img_bytes = C * H * W * 4
    if img_bytes <= budget_bytes:
        cb = C
        nb = max(1, min(N, budget_bytes // img_bytes))
        # keep >= 2 grid steps when N allows so both v7x TensorCores get work
        while nb > 1 and -(-N // nb) < 2:
            nb -= 1
        while N % nb:            # keep blocks evenly dividing the array
            nb -= 1
    else:
        nb = 1
        cb = max(1, budget_bytes // (H * W * 4))
        while C % cb:
            cb -= 1
    return nb, cb


def multi_bokeh_forward(x, scale_weights):
    """x: (N, C, H, W) float32, scale_weights: (len(SCALES),) float32."""
    N, C, H, W = x.shape
    nb, cb = _pick_blocks(N, C, H, W)

    # Fold the 1/k^2 box normalization into the blend weights on the host so
    # the kernel does one fused scale-and-accumulate per scale.
    inv_norm = jnp.array([1.0 / float((2 * r + 1) ** 2) for r in SCALES],
                         dtype=jnp.float32)
    s = scale_weights.astype(jnp.float32) * inv_norm

    return pl.pallas_call(
        bokeh_kernel,
        out_shape=jax.ShapeDtypeStruct((N, C, H, W), x.dtype),
        grid=(N // nb, C // cb),
        in_specs=[
            pl.BlockSpec(memory_space=pltpu.MemorySpace.SMEM),        # folded scalars
            pl.BlockSpec((nb, cb, H, W), lambda b, c: (b, c, 0, 0)),  # input tile
        ],
        out_specs=pl.BlockSpec((nb, cb, H, W), lambda b, c: (b, c, 0, 0)),
        compiler_params=pltpu.CompilerParams(
            dimension_semantics=("parallel", "parallel"),
            vmem_limit_bytes=48 * 1024 * 1024,
        ),
    )(s, x)


def reference(x, w):
    """Pure-JAX reference for correctness checking."""
    out = jnp.zeros_like(x)
    H, W = x.shape[2], x.shape[3]
    for si, r in enumerate(SCALES):
        if r == 0:
            blur = x
        else:
            k = 2 * r + 1
            xp = jnp.pad(x, ((0, 0), (0, 0), (r, r), (r, r)))
            blur = jnp.zeros_like(x)
            for dh in range(k):
                for dw in range(k):
                    blur = blur + xp[:, :, dh:dh + H, dw:dw + W]
            blur = blur / float(k * k)
        out = out + w[si] * blur
    return out


if __name__ == "__main__":
    key = jax.random.PRNGKey(0)
    x = jax.random.normal(key, (2, 4, 16, 16), dtype=jnp.float32)
    # Deterministic "parameters": per-scale blend weights.
    scale_weights = jnp.array([0.4, 0.3, 0.2, 0.1], dtype=jnp.float32)

    out = multi_bokeh_forward(x, scale_weights)
    out = jax.block_until_ready(out)

    ref = reference(x, scale_weights)
    assert out.shape == x.shape and out.dtype == x.dtype
    if not jnp.allclose(out, ref, atol=1e-5, rtol=1e-5):
        raise AssertionError("Pallas kernel does not match reference")
    print("KERNEL_OK")
</pallas_src>

<mosaic_0001>
module attributes {stable_mosaic.version = 11 : i64} {
  func.func @bokeh_kernel(%arg0: i32, %arg1: i32, %arg2: memref<4xf32, #tpu.memory_space<smem>>, %arg3: memref<1x4x16x16xf32, #tpu.memory_space<vmem>>, %arg4: memref<1x4x16x16xf32, #tpu.memory_space<vmem>>) attributes {dimension_semantics = [#tpu.dimension_semantics<parallel>, #tpu.dimension_semantics<parallel>], iteration_bounds = array<i64: 2, 1>, scalar_prefetch = 0 : i64, scratch_operands = 0 : i64, tpu.core_type = #tpu.core_type<tc>, window_params = [{transform_indices = @transform_0, window_bounds = array<i64: 4>}, {transform_indices = @transform_1, window_bounds = array<i64: 1, 4, 16, 16>}, {transform_indices = @transform_2, window_bounds = array<i64: 1, 4, 16, 16>}]} {
    %c0 = arith.constant 0 : index
    %c0_0 = arith.constant 0 : index
    %c0_1 = arith.constant 0 : index
    %c0_2 = arith.constant 0 : index
    %0 = vector.load %arg3[%c0, %c0_0, %c0_1, %c0_2] : memref<1x4x16x16xf32, #tpu.memory_space<vmem>>, vector<1x4x16x16xf32>
    %1 = vector.shape_cast %0 : vector<1x4x16x16xf32> to vector<4x16x16xf32>
    %2 = tpu.iota {dimensions = array<i32: 1>} : vector<4x16x16xi32>
    %3 = tpu.iota {dimensions = array<i32: 2>} : vector<4x16x16xi32>
    %c1_i32 = arith.constant 1 : i32
    %4 = vector.broadcast %c1_i32 : i32 to vector<4x16x16xi32>
    %5 = arith.cmpi sge, %2, %4 : vector<4x16x16xi32>
    %c15_i32 = arith.constant 15 : i32
    %6 = vector.broadcast %c15_i32 : i32 to vector<4x16x16xi32>
    %7 = arith.cmpi slt, %2, %6 : vector<4x16x16xi32>
    %c2_i32 = arith.constant 2 : i32
    %8 = vector.broadcast %c2_i32 : i32 to vector<4x16x16xi32>
    %9 = arith.cmpi sge, %2, %8 : vector<4x16x16xi32>
    %c14_i32 = arith.constant 14 : i32
    %10 = vector.broadcast %c14_i32 : i32 to vector<4x16x16xi32>
    %11 = arith.cmpi slt, %2, %10 : vector<4x16x16xi32>
    %c3_i32 = arith.constant 3 : i32
    %12 = vector.broadcast %c3_i32 : i32 to vector<4x16x16xi32>
    %13 = arith.cmpi sge, %2, %12 : vector<4x16x16xi32>
    %c13_i32 = arith.constant 13 : i32
    %14 = vector.broadcast %c13_i32 : i32 to vector<4x16x16xi32>
    %15 = arith.cmpi slt, %2, %14 : vector<4x16x16xi32>
    %c1_i32_3 = arith.constant 1 : i32
    %16 = vector.broadcast %c1_i32_3 : i32 to vector<4x16x16xi32>
    %17 = arith.cmpi sge, %3, %16 : vector<4x16x16xi32>
    %c15_i32_4 = arith.constant 15 : i32
    %18 = vector.broadcast %c15_i32_4 : i32 to vector<4x16x16xi32>
    %19 = arith.cmpi slt, %3, %18 : vector<4x16x16xi32>
    %c2_i32_5 = arith.constant 2 : i32
    %20 = vector.broadcast %c2_i32_5 : i32 to vector<4x16x16xi32>
    %21 = arith.cmpi sge, %3, %20 : vector<4x16x16xi32>
    %c14_i32_6 = arith.constant 14 : i32
    %22 = vector.broadcast %c14_i32_6 : i32 to vector<4x16x16xi32>
    %23 = arith.cmpi slt, %3, %22 : vector<4x16x16xi32>
    %c3_i32_7 = arith.constant 3 : i32
    %24 = vector.broadcast %c3_i32_7 : i32 to vector<4x16x16xi32>
    %25 = arith.cmpi sge, %3, %24 : vector<4x16x16xi32>
    %c13_i32_8 = arith.constant 13 : i32
    %26 = vector.broadcast %c13_i32_8 : i32 to vector<4x16x16xi32>
    %27 = arith.cmpi slt, %3, %26 : vector<4x16x16xi32>
    %c0_9 = arith.constant 0 : index
    %28 = memref.load %arg2[%c0_9] : memref<4xf32, #tpu.memory_space<smem>>
    %29 = vector.broadcast %28 : f32 to vector<4x16x16xf32>
    %30 = arith.mulf %29, %1 : vector<4x16x16xf32>
    %c1_i32_10 = arith.constant 1 : i32
    %31 = tpu.dynamic_rotate %1 by %c1_i32_10 dim 2 : vector<4x16x16xf32>, i32 -> vector<4x16x16xf32>
    %cst = arith.constant 0.000000e+00 : f32
    %32 = vector.broadcast %cst : f32 to vector<4x16x16xf32>
    %33 = arith.select %17, %31, %32 : vector<4x16x16xi1>, vector<4x16x16xf32>
    %34 = arith.addf %1, %33 : vector<4x16x16xf32>
    %c15_i32_11 = arith.constant 15 : i32
    %35 = tpu.dynamic_rotate %1 by %c15_i32_11 dim 2 : vector<4x16x16xf32>, i32 -> vector<4x16x16xf32>
    %cst_12 = arith.constant 0.000000e+00 : f32
    %36 = vector.broadcast %cst_12 : f32 to vector<4x16x16xf32>
    %37 = arith.select %19, %35, %36 : vector<4x16x16xi1>, vector<4x16x16xf32>
    %38 = arith.addf %34, %37 : vector<4x16x16xf32>
    %c1_i32_13 = arith.constant 1 : i32
    %39 = tpu.dynamic_rotate %38 by %c1_i32_13 dim 1 : vector<4x16x16xf32>, i32 -> vector<4x16x16xf32>
    %cst_14 = arith.constant 0.000000e+00 : f32
    %40 = vector.broadcast %cst_14 : f32 to vector<4x16x16xf32>
    %41 = arith.select %5, %39, %40 : vector<4x16x16xi1>, vector<4x16x16xf32>
    %42 = arith.addf %38, %41 : vector<4x16x16xf32>
    %c15_i32_15 = arith.constant 15 : i32
    %43 = tpu.dynamic_rotate %38 by %c15_i32_15 dim 1 : vector<4x16x16xf32>, i32 -> vector<4x16x16xf32>
    %cst_16 = arith.constant 0.000000e+00 : f32
    %44 = vector.broadcast %cst_16 : f32 to vector<4x16x16xf32>
    %45 = arith.select %7, %43, %44 : vector<4x16x16xi1>, vector<4x16x16xf32>
    %46 = arith.addf %42, %45 : vector<4x16x16xf32>
    %c1 = arith.constant 1 : index
    %47 = memref.load %arg2[%c1] : memref<4xf32, #tpu.memory_space<smem>>
    %48 = vector.broadcast %47 : f32 to vector<4x16x16xf32>
    %49 = arith.mulf %48, %46 : vector<4x16x16xf32>
    %50 = arith.addf %30, %49 : vector<4x16x16xf32>
    %c2_i32_17 = arith.constant 2 : i32
    %51 = tpu.dynamic_rotate %1 by %c2_i32_17 dim 2 : vector<4x16x16xf32>, i32 -> vector<4x16x16xf32>
    %cst_18 = arith.constant 0.000000e+00 : f32
    %52 = vector.broadcast %cst_18 : f32 to vector<4x16x16xf32>
    %53 = arith.select %21, %51, %52 : vector<4x16x16xi1>, vector<4x16x16xf32>
    %54 = arith.addf %38, %53 : vector<4x16x16xf32>
    %c14_i32_19 = arith.constant 14 : i32
    %55 = tpu.dynamic_rotate %1 by %c14_i32_19 dim 2 : vector<4x16x16xf32>, i32 -> vector<4x16x16xf32>
    %cst_20 = arith.constant 0.000000e+00 : f32
    %56 = vector.broadcast %cst_20 : f32 to vector<4x16x16xf32>
    %57 = arith.select %23, %55, %56 : vector<4x16x16xi1>, vector<4x16x16xf32>
    %58 = arith.addf %54, %57 : vector<4x16x16xf32>
    %c1_i32_21 = arith.constant 1 : i32
    %59 = tpu.dynamic_rotate %58 by %c1_i32_21 dim 1 : vector<4x16x16xf32>, i32 -> vector<4x16x16xf32>
    %cst_22 = arith.constant 0.000000e+00 : f32
    %60 = vector.broadcast %cst_22 : f32 to vector<4x16x16xf32>
    %61 = arith.select %5, %59, %60 : vector<4x16x16xi1>, vector<4x16x16xf32>
    %62 = arith.addf %58, %61 : vector<4x16x16xf32>
    %c15_i32_23 = arith.constant 15 : i32
    %63 = tpu.dynamic_rotate %58 by %c15_i32_23 dim 1 : vector<4x16x16xf32>, i32 -> vector<4x16x16xf32>
    %cst_24 = arith.constant 0.000000e+00 : f32
    %64 = vector.broadcast %cst_24 : f32 to vector<4x16x16xf32>
    %65 = arith.select %7, %63, %64 : vector<4x16x16xi1>, vector<4x16x16xf32>
    %66 = arith.addf %62, %65 : vector<4x16x16xf32>
    %c2_i32_25 = arith.constant 2 : i32
    %67 = tpu.dynamic_rotate %58 by %c2_i32_25 dim 1 : vector<4x16x16xf32>, i32 -> vector<4x16x16xf32>
    %cst_26 = arith.constant 0.000000e+00 : f32
    %68 = vector.broadcast %cst_26 : f32 to vector<4x16x16xf32>
    %69 = arith.select %9, %67, %68 : vector<4x16x16xi1>, vector<4x16x16xf32>
    %70 = arith.addf %66, %69 : vector<4x16x16xf32>
    %c14_i32_27 = arith.constant 14 : i32
    %71 = tpu.dynamic_rotate %58 by %c14_i32_27 dim 1 : vector<4x16x16xf32>, i32 -> vector<4x16x16xf32>
    %cst_28 = arith.constant 0.000000e+00 : f32
    %72 = vector.broadcast %cst_28 : f32 to vector<4x16x16xf32>
    %73 = arith.select %11, %71, %72 : vector<4x16x16xi1>, vector<4x16x16xf32>
    %74 = arith.addf %70, %73 : vector<4x16x16xf32>
    %c2 = arith.constant 2 : index
    %75 = memref.load %arg2[%c2] : memref<4xf32, #tpu.memory_space<smem>>
    %76 = vector.broadcast %75 : f32 to vector<4x16x16xf32>
    %77 = arith.mulf %76, %74 : vector<4x16x16xf32>
    %78 = arith.addf %50, %77 : vector<4x16x16xf32>
    %c3_i32_29 = arith.constant 3 : i32
    %79 = tpu.dynamic_rotate %1 by %c3_i32_29 dim 2 : vector<4x16x16xf32>, i32 -> vector<4x16x16xf32>
    %cst_30 = arith.constant 0.000000e+00 : f32
    %80 = vector.broadcast %cst_30 : f32 to vector<4x16x16xf32>
    %81 = arith.select %25, %79, %80 : vector<4x16x16xi1>, vector<4x16x16xf32>
    %82 = arith.addf %58, %81 : vector<4x16x16xf32>
    %c13_i32_31 = arith.constant 13 : i32
    %83 = tpu.dynamic_rotate %1 by %c13_i32_31 dim 2 : vector<4x16x16xf32>, i32 -> vector<4x16x16xf32>
    %cst_32 = arith.constant 0.000000e+00 : f32
    %84 = vector.broadcast %cst_32 : f32 to vector<4x16x16xf32>
    %85 = arith.select %27, %83, %84 : vector<4x16x16xi1>, vector<4x16x16xf32>
    %86 = arith.addf %82, %85 : vector<4x16x16xf32>
    %c1_i32_33 = arith.constant 1 : i32
    %87 = tpu.dynamic_rotate %86 by %c1_i32_33 dim 1 : vector<4x16x16xf32>, i32 -> vector<4x16x16xf32>
    %cst_34 = arith.constant 0.000000e+00 : f32
    %88 = vector.broadcast %cst_34 : f32 to vector<4x16x16xf32>
    %89 = arith.select %5, %87, %88 : vector<4x16x16xi1>, vector<4x16x16xf32>
    %90 = arith.addf %86, %89 : vector<4x16x16xf32>
    %c15_i32_35 = arith.constant 15 : i32
    %91 = tpu.dynamic_rotate %86 by %c15_i32_35 dim 1 : vector<4x16x16xf32>, i32 -> vector<4x16x16xf32>
    %cst_36 = arith.constant 0.000000e+00 : f32
    %92 = vector.broadcast %cst_36 : f32 to vector<4x16x16xf32>
    %93 = arith.select %7, %91, %92 : vector<4x16x16xi1>, vector<4x16x16xf32>
    %94 = arith.addf %90, %93 : vector<4x16x16xf32>
    %c2_i32_37 = arith.constant 2 : i32
    %95 = tpu.dynamic_rotate %86 by %c2_i32_37 dim 1 : vector<4x16x16xf32>, i32 -> vector<4x16x16xf32>
    %cst_38 = arith.constant 0.000000e+00 : f32
    %96 = vector.broadcast %cst_38 : f32 to vector<4x16x16xf32>
    %97 = arith.select %9, %95, %96 : vector<4x16x16xi1>, vector<4x16x16xf32>
    %98 = arith.addf %94, %97 : vector<4x16x16xf32>
    %c14_i32_39 = arith.constant 14 : i32
    %99 = tpu.dynamic_rotate %86 by %c14_i32_39 dim 1 : vector<4x16x16xf32>, i32 -> vector<4x16x16xf32>
    %cst_40 = arith.constant 0.000000e+00 : f32
    %100 = vector.broadcast %cst_40 : f32 to vector<4x16x16xf32>
    %101 = arith.select %11, %99, %100 : vector<4x16x16xi1>, vector<4x16x16xf32>
    %102 = arith.addf %98, %101 : vector<4x16x16xf32>
    %c3_i32_41 = arith.constant 3 : i32
    %103 = tpu.dynamic_rotate %86 by %c3_i32_41 dim 1 : vector<4x16x16xf32>, i32 -> vector<4x16x16xf32>
    %cst_42 = arith.constant 0.000000e+00 : f32
    %104 = vector.broadcast %cst_42 : f32 to vector<4x16x16xf32>
    %105 = arith.select %13, %103, %104 : vector<4x16x16xi1>, vector<4x16x16xf32>
    %106 = arith.addf %102, %105 : vector<4x16x16xf32>
    %c13_i32_43 = arith.constant 13 : i32
    %107 = tpu.dynamic_rotate %86 by %c13_i32_43 dim 1 : vector<4x16x16xf32>, i32 -> vector<4x16x16xf32>
    %cst_44 = arith.constant 0.000000e+00 : f32
    %108 = vector.broadcast %cst_44 : f32 to vector<4x16x16xf32>
    %109 = arith.select %15, %107, %108 : vector<4x16x16xi1>, vector<4x16x16xf32>
    %110 = arith.addf %106, %109 : vector<4x16x16xf32>
    %c3 = arith.constant 3 : index
    %111 = memref.load %arg2[%c3] : memref<4xf32, #tpu.memory_space<smem>>
    %112 = vector.broadcast %111 : f32 to vector<4x16x16xf32>
    %113 = arith.mulf %112, %110 : vector<4x16x16xf32>
    %114 = arith.addf %78, %113 : vector<4x16x16xf32>
    %115 = vector.shape_cast %114 : vector<4x16x16xf32> to vector<1x4x16x16xf32>
    %c0_45 = arith.constant 0 : index
    %c0_46 = arith.constant 0 : index
    %c0_47 = arith.constant 0 : index
    %c0_48 = arith.constant 0 : index
    %116 = vector.load %arg4[%c0_45, %c0_46, %c0_47, %c0_48] : memref<1x4x16x16xf32, #tpu.memory_space<vmem>>, vector<1x4x16x16xf32>
    tpu.vector_store %arg4[%c0_45, %c0_46, %c0_47, %c0_48], %115 {strides = array<i32>} : memref<1x4x16x16xf32, #tpu.memory_space<vmem>>, vector<1x4x16x16xf32>,
    return
  }
  func.func @transform_0(%arg0: i32, %arg1: i32) -> i32 {
    %c0_i32 = arith.constant 0 : i32
    %c0_i32_0 = arith.constant 0 : i32
    return %c0_i32 : i32
  }
  func.func @transform_1(%arg0: i32, %arg1: i32) -> (i32, i32, i32, i32) {
    %c0_i32 = arith.constant 0 : i32
    %c0_i32_0 = arith.constant 0 : i32
    %c0_i32_1 = arith.constant 0 : i32
    return %arg0, %arg1, %c0_i32, %c0_i32_0 : i32, i32, i32, i32
  }
  func.func @transform_2(%arg0: i32, %arg1: i32) -> (i32, i32, i32, i32) {
    %c0_i32 = arith.constant 0 : i32
    %c0_i32_0 = arith.constant 0 : i32
    %c0_i32_1 = arith.constant 0 : i32
    return %arg0, %arg1, %c0_i32, %c0_i32_0 : i32, i32, i32, i32
  }
}

</mosaic_0001>

<bundles_post_ra>
// kernel: tpu_custom_call.1
= control target key start
LH: loop header
LB: loop body
LE: loop exit
PB: predicated region body
PF: predicated region fallthrough
CT: control target
= control target key end

     0   :  { %s2318_s0 = inlined_call_operand.hbm [shape: f32[4], index: 0, kind: input, shape index: {}]   ;;  %s2319_s1 = inlined_call_operand.hbm [shape: f32[2,4,16,16], index: 1, kind: input, shape index: {}]   ;;  %s2320_s2 = inlined_call_operand.hbm [shape: f32[2,4,16,16], index: 2, kind: output, shape index: {}]  }
   0x1   :  { %2321 = sst [smem:[#allocation11_spill]] %s2318_s0 }
   0x2   :  { %7 = vsyncpa [#allocation5], 0 }
   0x3   :  { %8 = vsyncpa [#allocation3], 0 }
   0x4   :  { %10 = vsyncpa [#allocation3 + $0x1], 0 }
   0x5   :  { %11 = vsyncpa [#allocation4], 0 }
   0x6   :  { %13 = vsyncpa [#allocation4 + $0x1], 0  ;;  %s1362_s9 = smov 0   ;;  %s1364_s10 = smov 0  }
   0x7   :  { %s1366_s11 = smov 0   ;;  %s1368_s12 = smov 0  }
   0x8   :  { %s1370_s13 = smov 0   ;;  %s1372_s14 = smov 0  }
   0x9 LB: > { %s1102_s15 = sadd.s32 4294967295, %s1331_s14   ;;  %s1103_s16 = sadd.s32 4294967294, %s1331_s14   ;;  %s1331_s14 = sphi %s1372_s14, %s19_s14   ;;  %s1327_s13 = sphi %s1370_s13, %s2335_s13   ;;  %s1323_s12 = sphi %s1368_s12, %s2334_s12   ;;  %s1319_s11 = sphi %s1366_s11, %s2333_s11   ;;  %s1315_s10 = sphi %s1364_s10, %s2332_s10   ;;  %s1311_s9 = sphi %s1362_s9, %s2331_s9  }
   0xa   : > { %s61_s17 = sadd.s32 1, %s1319_s11  ;;  %p68_p0 = scmp.ne.s32.totalorder %s1319_s11, %s1315_s10 }
   0xb   : > { %p69_p1 = scmp.eq.s32.totalorder %s1331_s14, 0  ;;  %p74_p2 = scmp.ne.s32.totalorder %s1315_s10, %s1311_s9 }
   0xc   : > { %p1400_p3 = scmp.eq.s32.totalorder %s1102_s15, 0  ;;  %p100_p4 = scmp.eq.s32.totalorder %s1102_s15, 1 }
   0xd   : > { %p70_p5 = por %p69_p1, %p68_p0  ;;  %p106_p6 = scmp.eq.s32.totalorder %s1103_s16, 1 }
   0xe   : > { %p1406_p7 = por %p1400_p3, %p74_p2  ;;  %p1410_p8 = por %p100_p4, %p68_p0 }
   0xf   : > { %p1414_p9 = por %p106_p6, %p74_p2  ;;  %p1104_p10 = scmp.ge.s32.totalorder %s1331_s14, 1 }
  0x10   : > { %p113_p11 = scmp.lt.s32.totalorder %s1331_s14, 3  ;;  %p1145_p1 = scmp.lt.s32.totalorder %s1331_s14, 2 }
  0x11   : > { %s2325_s21 = scalar_select %p1414_p9, 1, 0 }
  0x12   : > { %p1421_p13 = pnand %p1104_p10, %p113_p11  ;;  %s135_s23 = sand.u32 1, %s1319_s11  }
  0x13   : > { %p1429_p2 = pnand %p1145_p1, %p70_p5  ;;  %s31_s25 = sadd.s32 1, %s1327_s13 }
  0x14   : > { %p1132_p0 = pneg %p1421_p13  ;;  %s1107_s26 = sshll.u32 %s135_s23, 6 }
  0x15   : > { %p33_p6 = scmp.ge.s32.totalorder %s31_s25, 2  ;;  %s1333_s27 = smov [#allocation2]  }
  0x16   : > { %p1133_p4 = pnand %p1132_p0, %p1400_p3  ;;  %s2328_s0 = sld [smem:[#allocation11_spill]] }
  0x17   : > { %s2337_s25 = smov (%p33_p6, %s31_s25), 0  ;;  %s1122_s30 = sshll.u32 %s1327_s13, 10 }
  0x18   : > { %s56_s3 = ssub.s32 %s1327_s13, %s2337_s25  ;;  %s148_s6 = scalar_lea.hbm %s2319_s1, %s1122_s30 }
  0x19   : > { %p59_p5 = scmp.eq.s32.totalorder %s56_s3, 0  ;;  %s139_s7 = scalar_lea.vmem [#allocation6], %s1107_s26 }
  0x1a   : > { %s149_s8 = sshll.u32 %s139_s7, 4  ;;  %s136_s16 = scalar_lea.sflag [#allocation3], %s135_s23  ;;  %s150_s8 = int_to_ptr.vmem [resolvable:$true] %s149_s8 }
  0x1b   : > { %s1450_s15 = scalar_select %p59_p5, %s1319_s11, %s61_s17  }
  0x1c   : > { %1135 = dma.hbm_to_smem (!%p1133_p4), %s2328_s0, 16, %s1333_s27, [#allocation5]  }
  0x1d   : > { %p1221_p10 = pneg %p1429_p2  ;;  %s1232_s27 = scalar_lea.vmem %s150_s8, 1024 }
  0x1e   : > { %p1233_p11 = scmp.ne.s32.totalorder %s150_s8, %s1232_s27  ;;  %s1334_s28 = smov [#allocation6]  }
  0x1f   : > { %s1237_s29 = sshll.u32 %s1334_s28, 4  ;;  %s1238_s29 = int_to_ptr.vmem [resolvable:$false] %s1237_s29 }
  0x20   : > { %p1235_p1 = pnand %p1233_p11, %p1221_p10  ;;  %s1239_s0 = scalar_lea.vmem %s1238_s29, 2048 }
  0x21   : > { %p1240_p4 = scmp.lt.s32.totalorder %s150_s8, %s1238_s29  ;;  %p1241_p6 = scmp.lt.s32.totalorder %s1239_s0, %s1232_s27 }
  0x22   : > { %p1236_p0 = pneg %p1235_p1 }
  0x23   : > { %p1242_p12 = por %p1241_p6, %p1240_p4 }
  0x25   : > { %p1243_p9 = pnand %p1242_p12, %p1236_p0 }
  0x27   : > { %1246 = shalt.err (!%p1243_p9)
}
  0x28   : > { %s1335_s26 = smov 128   ;;  %s1336_s17 = smov 8  }
  0x29   : > { %1139 = dma.hbm_to_vmem [thread:$0]  (!%p1429_p2), %s148_s6, 1024, %s150_s8, %s136_s16, %s1335_s26, %s1335_s26, %s1336_s17  }
  0x2a   : > { %161 = sbr.rel (%p1421_p13) target bundleno = 566 (0x236), region = 28 }
  0x2f   : > { %1298 = dma.done.wait (%p1400_p3), [#allocation5], 16  }
  0x30   : > { %1300 = vsyncadd (%p1400_p3), [#allocation5], 4294967280  ;;  %s1463_s0 = sand.u32 1, %s1315_s10  }
  0x31   : > { %s1112_s23 = sshll.u32 %s1463_s0, 6  ;;  %s168_s30 = scalar_lea.sflag [#allocation3], %s1463_s0 }
  0x32   : > { %s171_s24 = scalar_lea.vmem [#allocation6], %s1112_s23 }
  0x33   : > { %1302 = dma.done.wait (%p1406_p7), %s168_s30, 1024  }
  0x34   : > { %1304 = vsyncadd (%p1406_p7), %s168_s30, 4294966272 }
  0x35   : > { %176 = sfence }
  0x36   : > { %v1473_v0 = vld [vmem:[%s171_s24] sm:$0xff]  ;;  %v1475_v1 = vld [vmem:[%s171_s24 + $0x10] sm:$0xff]  ;;  %s1337_s18 = smov 16   ;;  %v1481_v2 = vld [vmem:[%s171_s24 + $0x8] sm:$0xff]  ;;  %vm236_vm0 = vcmask 1047680   ;;  %s1338_s19 = smov 113   ;;  %v203_v41 = vlaneseq }
  0x37   : > { %237 = vrot.lane.b32.xlu0 %v1473_v0, %s1337_s18  ;;  %243 = vrot.lane.b32.xlu1 %v1475_v1, %s1337_s18  ;;  %v1483_v3 = vld [vmem:[%s171_s24 + $0x18] sm:$0xff]  ;;  %v1489_v4 = vld [vmem:[%s171_s24 + $0x20] sm:$0xff]  ;;  %s1339_s22 = smov 127   ;;  %s1340_s3 = smov 114  }
  0x38   : > { %v1491_v5 = vld [vmem:[%s171_s24 + $0x28] sm:$0xff]  ;;  %v1497_v6 = vld [vmem:[%s171_s24 + $0x30] sm:$0xff]  ;;  %v1499_v7 = vld [vmem:[%s171_s24 + $0x38] sm:$0xff]  ;;  %s1341_s4 = smov 126   ;;  %s1342_s5 = smov 115   ;;  %v1545_v44 = vand.u32 127, %v203_v41 }
  0x39   : > { %s1343_s6 = smov 125   ;;  %v1551_v50 = vshrl.u32 %v203_v41, 7  ;;  %s1576_s7 = sld [smem:[#allocation2]] }
  0x3a   : > { %vm220_vm1 = vcmp.ge.s32.totalorder %v1545_v44, 1  ;;  %vm221_vm2 = vcmp.lt.s32.totalorder %v1545_v44, 15  ;;  %s1638_s8 = sld [smem:[#allocation2 + $0x1]]  ;;  %vm222_vm7 = vcmp.ge.s32.totalorder %v1545_v44, 2  ;;  %vm223_vm8 = vcmp.lt.s32.totalorder %v1545_v44, 14  ;;  %s2140_s28 = scalar_lea.vmem [#allocation7], %s1112_s23 }
  0x3b   : > { %240 = vrot.lane.b32.xlu0 %v1481_v2, %s1337_s18  ;;  %246 = vrot.lane.b32.xlu1 %v1483_v3, %s1337_s18  ;;  %v1563_v58 = vadd.s32 8, %v1551_v50  ;;  %vm208_vm3 = vcmp.ge.s32.totalorder %v1551_v50, 1  ;;  %vm381_vm4 = vcmp.lt.s32.totalorder %v1551_v50, 1  ;;  %vm414_vm5 = vcmp.lt.s32.totalorder %v1551_v50, 7  ;;  %s1669_s16 = sld [smem:[#allocation2 + $0x2]]  ;;  %s1123_s29 = sshll.u32 %s1323_s12, 10 }
  0x3c   : > { %s1677_s27 = sld [smem:[#allocation2 + $0x3]]  ;;  %vm609_vm9 = vcmp.lt.s32.totalorder %v1551_v50, 2  ;;  %vm642_vm10 = vcmp.lt.s32.totalorder %v1551_v50, 6  ;;  %vm212_vm11 = vcmp.ge.s32.totalorder %v1551_v50, 2  ;;  %vm224_vm13 = vcmp.ge.s32.totalorder %v1545_v44, 3  ;;  %s1003_s26 = sshll.u32 %s2140_s28, 4  ;;  %s2264_s26 = int_to_ptr.vmem [resolvable:$true] %s1003_s26 }
  0x3d   : > { %vm211_vm6 = vcmp.lt.s32.totalorder %v1563_v58, 15  ;;  %vm215_vm12 = vcmp.lt.s32.totalorder %v1563_v58, 14  ;;  %vm225_vm14 = vcmp.lt.s32.totalorder %v1545_v44, 13  ;;  %vm901_vm15 = vcmp.lt.s32.totalorder %v1551_v50, 3  ;;  %s2262_s30 = scalar_lea.hbm %s2320_s2, %s1123_s29  ;;  %s987_s12 = scalar_lea.sflag [#allocation4], %s1463_s0 }
  0x3e   : > { %s1247_s24 = scalar_lea.vmem %s2264_s26, 1024 }
  0x3f   : > { %249 = vrot.lane.b32.xlu0 %v1489_v4, %s1337_s18  ;;  %252 = vrot.lane.b32.xlu1 %v1491_v5, %s1337_s18  ;;  %p1248_p3 = scmp.ne.s32.totalorder %s2264_s26, %s1247_s24 }
  0x41   : > { %p1249_p7 = pnand %p1248_p3, %p1410_p8 }
  0x43   : > { %255 = vrot.lane.b32.xlu0 %v1497_v6, %s1337_s18  ;;  %258 = vrot.lane.b32.xlu1 %v1499_v7, %s1337_s18  ;;  %p1250_p9 = pneg %p1249_p7 }
  0xa9   : > { %v238_v8 = vpop.permute.xlu0 %237  ;;  %v244_v9 = vpop.permute.xlu1 %243 }
  0xaa   : > { %v239_v10 = vsel %vm236_vm0, %v238_v8, %v1473_v0  ;;  %v245_v11 = vsel %vm236_vm0, %v244_v9, %v1475_v1 }
  0xab   : > { %261 = vrot.lane.b32.xlu0 %v239_v10, %s1337_s18 }
  0xad   : > { %v241_v12 = vpop.permute.xlu0 %240  ;;  %v247_v13 = vpop.permute.xlu1 %246 }
  0xae   : > { %v242_v14 = vsel %vm236_vm0, %v241_v12, %v1481_v2  ;;  %v248_v15 = vsel %vm236_vm0, %v247_v13, %v1483_v3 }
  0xaf   : > { %265 = vrot.lane.b32.xlu0 %v245_v11, %s1337_s18  ;;  %263 = vrot.lane.b32.xlu1 %v242_v14, %s1337_s18 }
  0xb1   : > { %v250_v16 = vpop.permute.xlu0 %249  ;;  %v253_v17 = vpop.permute.xlu1 %252 }
  0xb2   : > { %v251_v18 = vsel %vm236_vm0, %v250_v16, %v1489_v4  ;;  %v254_v19 = vsel %vm236_vm0, %v253_v17, %v1491_v5 }
  0xb3   : > { %267 = vrot.lane.b32.xlu1 %v248_v15, %s1337_s18  ;;  %269 = vrot.lane.b32.xlu0 %v251_v18, %s1337_s18 }
  0xb5   : > { %v256_v20 = vpop.permute.xlu0 %255  ;;  %v259_v21 = vpop.permute.xlu1 %258 }
  0xb6   : > { %v257_v22 = vsel %vm236_vm0, %v256_v20, %v1497_v6  ;;  %v260_v23 = vsel %vm236_vm0, %v259_v21, %v1499_v7 }
  0xb7   : > { %271 = vrot.lane.b32.xlu1 %v254_v19, %s1337_s18  ;;  %273 = vrot.lane.b32.xlu0 %v257_v22, %s1337_s18 }
  0xbb   : > { %275 = vrot.lane.b32.xlu1 %v260_v23, %s1337_s18  ;;  %s1344_s18 = smov [#allocation7]  }
 0x11d   : > { %v262_v24 = vpop.permute.xlu0 %261 }
 0x11e   : > { %v277_v25 = vsel %vm236_vm0, %v262_v24, %v1473_v0 }
 0x11f   : > { %293 = vrot.lane.b32.xlu0 %v277_v25, %s1338_s19 }
 0x121   : > { %v264_v26 = vpop.permute.xlu1 %263  ;;  %v266_v27 = vpop.permute.xlu0 %265 }
 0x122   : > { %v278_v28 = vsel %vm236_vm0, %v264_v26, %v1481_v2  ;;  %v279_v29 = vsel %vm236_vm0, %v266_v27, %v1475_v1 }
 0x123   : > { %295 = vrot.lane.b32.xlu1 %v278_v28, %s1338_s19  ;;  %297 = vrot.lane.b32.xlu0 %v279_v29, %s1338_s19 }
 0x125   : > { %v268_v30 = vpop.permute.xlu1 %267  ;;  %v270_v31 = vpop.permute.xlu0 %269 }
 0x126   : > { %v280_v32 = vsel %vm236_vm0, %v268_v30, %v1483_v3  ;;  %v281_v33 = vsel %vm236_vm0, %v270_v31, %v1489_v4 }
 0x127   : > { %299 = vrot.lane.b32.xlu1 %v280_v32, %s1338_s19  ;;  %301 = vrot.lane.b32.xlu0 %v281_v33, %s1338_s19 }
 0x129   : > { %v272_v34 = vpop.permute.xlu1 %271  ;;  %v274_v35 = vpop.permute.xlu0 %273 }
 0x12a   : > { %v282_v36 = vsel %vm236_vm0, %v272_v34, %v1491_v5  ;;  %v283_v37 = vsel %vm236_vm0, %v274_v35, %v1497_v6 }
 0x12b   : > { %303 = vrot.lane.b32.xlu1 %v282_v36, %s1338_s19  ;;  %305 = vrot.lane.b32.xlu0 %v283_v37, %s1338_s19 }
 0x12d   : > { %v276_v38 = vpop.permute.xlu1 %275 }
 0x12e   : > { %v284_v39 = vsel %vm236_vm0, %v276_v38, %v1499_v7  ;;  %vm934_vm0 = vcmp.lt.s32.totalorder %v1551_v50, 5 }
 0x12f   : > { %307 = vrot.lane.b32.xlu1 %v284_v39, %s1338_s19  ;;  %333 = vrot.lane.b32.xlu0 %v277_v25, %s1339_s22  ;;  %s1251_s19 = sshll.u32 %s1344_s18, 4  ;;  %s1252_s19 = int_to_ptr.vmem [resolvable:$false] %s1251_s19 }
 0x130   : > { %p1254_p12 = scmp.lt.s32.totalorder %s2264_s26, %s1252_s19 }
 0x133   : > { %335 = vrot.lane.b32.xlu1 %v278_v28, %s1339_s22  ;;  %337 = vrot.lane.b32.xlu0 %v279_v29, %s1339_s22 }
 0x137   : > { %339 = vrot.lane.b32.xlu1 %v280_v32, %s1339_s22  ;;  %341 = vrot.lane.b32.xlu0 %v281_v33, %s1339_s22 }
 0x13b   : > { %343 = vrot.lane.b32.xlu1 %v282_v36, %s1339_s22  ;;  %345 = vrot.lane.b32.xlu0 %v283_v37, %s1339_s22 }
 0x13f   : > { %347 = vrot.lane.b32.xlu1 %v284_v39, %s1339_s22  ;;  %457 = vrot.lane.b32.xlu0 %v277_v25, %s1340_s3  ;;  %s1253_s22 = scalar_lea.vmem %s1252_s19, 2048 }
 0x140   : > { %p1255_p13 = scmp.lt.s32.totalorder %s1253_s22, %s1247_s24 }
 0x142   : > { %p1256_p2 = por %p1255_p13, %p1254_p12 }
 0x143   : > { %459 = vrot.lane.b32.xlu1 %v278_v28, %s1340_s3  ;;  %461 = vrot.lane.b32.xlu0 %v279_v29, %s1340_s3 }
 0x144   : > { %p1257_p5 = pnand %p1256_p2, %p1250_p9 }
 0x147   : > { %463 = vrot.lane.b32.xlu1 %v280_v32, %s1340_s3  ;;  %465 = vrot.lane.b32.xlu0 %v281_v33, %s1340_s3 }
 0x14b   : > { %467 = vrot.lane.b32.xlu1 %v282_v36, %s1340_s3  ;;  %469 = vrot.lane.b32.xlu0 %v283_v37, %s1340_s3 }
 0x14f   : > { %471 = vrot.lane.b32.xlu1 %v284_v39, %s1340_s3  ;;  %497 = vrot.lane.b32.xlu0 %v277_v25, %s1341_s4 }
 0x153   : > { %499 = vrot.lane.b32.xlu1 %v278_v28, %s1341_s4  ;;  %501 = vrot.lane.b32.xlu0 %v279_v29, %s1341_s4 }
 0x157   : > { %503 = vrot.lane.b32.xlu1 %v280_v32, %s1341_s4  ;;  %505 = vrot.lane.b32.xlu0 %v281_v33, %s1341_s4 }
 0x15b   : > { %507 = vrot.lane.b32.xlu1 %v282_v36, %s1341_s4  ;;  %509 = vrot.lane.b32.xlu0 %v283_v37, %s1341_s4 }
 0x15f   : > { %511 = vrot.lane.b32.xlu1 %v284_v39, %s1341_s4  ;;  %685 = vrot.lane.b32.xlu0 %v277_v25, %s1342_s5 }
 0x163   : > { %687 = vrot.lane.b32.xlu1 %v278_v28, %s1342_s5  ;;  %689 = vrot.lane.b32.xlu0 %v279_v29, %s1342_s5 }
 0x167   : > { %691 = vrot.lane.b32.xlu1 %v280_v32, %s1342_s5  ;;  %693 = vrot.lane.b32.xlu0 %v281_v33, %s1342_s5 }
 0x16b   : > { %695 = vrot.lane.b32.xlu1 %v282_v36, %s1342_s5  ;;  %697 = vrot.lane.b32.xlu0 %v283_v37, %s1342_s5 }
 0x16f   : > { %699 = vrot.lane.b32.xlu1 %v284_v39, %s1342_s5  ;;  %725 = vrot.lane.b32.xlu0 %v277_v25, %s1343_s6 }
 0x173   : > { %727 = vrot.lane.b32.xlu1 %v278_v28, %s1343_s6  ;;  %729 = vrot.lane.b32.xlu0 %v279_v29, %s1343_s6 }
 0x177   : > { %731 = vrot.lane.b32.xlu1 %v280_v32, %s1343_s6  ;;  %733 = vrot.lane.b32.xlu0 %v281_v33, %s1343_s6 }
 0x17b   : > { %735 = vrot.lane.b32.xlu1 %v282_v36, %s1343_s6  ;;  %737 = vrot.lane.b32.xlu0 %v283_v37, %s1343_s6 }
 0x17f   : > { %739 = vrot.lane.b32.xlu1 %v284_v39, %s1343_s6 }
 0x191   : > { %v294_v40 = vpop.permute.xlu0 %293 }
 0x192   : > { %v317_v49 = vsel %vm220_vm1, %v294_v40, 0.0 }
 0x193   : > { %v325_v53 = vadd.f32 %v317_v49, %v1473_v0 }
 0x195   : > { %v296_v42 = vpop.permute.xlu1 %295  ;;  %v298_v43 = vpop.permute.xlu0 %297 }
 0x196   : > { %v318_v54 = vsel %vm220_vm1, %v296_v42, 0.0  ;;  %v319_v56 = vsel %vm220_vm1, %v298_v43, 0.0 }
 0x197   : > { %v326_v59 = vadd.f32 %v318_v54, %v1481_v2  ;;  %v327_v10 = vadd.f32 %v319_v56, %v1475_v1 }
 0x199   : > { %v300_v45 = vpop.permute.xlu1 %299  ;;  %v302_v46 = vpop.permute.xlu0 %301 }
 0x19a   : > { %v320_v60 = vsel %vm220_vm1, %v300_v45, 0.0  ;;  %v321_v61 = vsel %vm220_vm1, %v302_v46, 0.0  ;;  %v227_v45 = vstv %s1576_s7 }
 0x19b   : > { %v328_v13 = vadd.f32 %v320_v60, %v1483_v3  ;;  %v329_v14 = vadd.f32 %v321_v61, %v1489_v4 }
 0x19d   : > { %v304_v47 = vpop.permute.xlu1 %303  ;;  %v306_v48 = vpop.permute.xlu0 %305 }
 0x19e   : > { %v322_v11 = vsel %vm220_vm1, %v304_v47, 0.0  ;;  %v323_v23 = vsel %vm220_vm1, %v306_v48, 0.0 }
 0x19f   : > { %v330_v22 = vadd.f32 %v322_v11, %v1491_v5  ;;  %v331_v48 = vadd.f32 %v323_v23, %v1497_v6 }
 0x1a1   : > { %v308_v51 = vpop.permute.xlu1 %307  ;;  %v334_v52 = vpop.permute.xlu0 %333 }
 0x1a2   : > { %v357_v55 = vsel %vm221_vm2, %v334_v52, 0.0  ;;  %v324_v54 = vsel %vm220_vm1, %v308_v51, 0.0  ;;  %vm216_vm1 = vcmp.ge.s32.totalorder %v1551_v50, 3 }
 0x1a3   : > { %v1560_v57 = vadd.f32 %v357_v55, %v325_v53 }
 0x1a5   : > { %v336_v62 = vpop.permute.xlu1 %335  ;;  %v338_v63 = vpop.permute.xlu0 %337  ;;  %v373_v15 = vrot.slane %v1560_v57, 7  ;;  %v406_v16 = vrot.slane %v1560_v57, 1 }
 0x1a6   : > { %v358_v8 = vsel %vm221_vm2, %v336_v62, 0.0  ;;  %v359_v9 = vsel %vm221_vm2, %v338_v63, 0.0 }
 0x1a7   : > { %v1582_v12 = vadd.f32 %v358_v8, %v326_v59  ;;  %v1591_v19 = vadd.f32 %v359_v9, %v327_v10 }
 0x1a9   : > { %v377_v17 = vrot.slane %v1582_v12, 7  ;;  %v410_v18 = vrot.slane %v1582_v12, 1  ;;  %v340_v20 = vpop.permute.xlu1 %339  ;;  %v342_v21 = vpop.permute.xlu0 %341  ;;  %v374_v35 = vrot.slane %v1591_v19, 7  ;;  %v407_v36 = vrot.slane %v1591_v19, 1 }
 0x1aa   : > { %v360_v24 = vsel %vm221_vm2, %v340_v20, 0.0  ;;  %v361_v25 = vsel %vm221_vm2, %v342_v21, 0.0 }
 0x1ab   : > { %v382_v26 = vsel %vm381_vm4, %v373_v15, %v377_v17  ;;  %v386_v27 = vsel %vm381_vm4, %v377_v17, %v373_v15  ;;  %v415_v28 = vsel %vm414_vm5, %v406_v16, %v410_v18  ;;  %v419_v29 = vsel %vm414_vm5, %v410_v18, %v406_v16 }
 0x1ac   : > { %v390_v30 = vsel %vm208_vm3, %v386_v27, 0.0  ;;  %v399_v31 = vadd.f32 %v382_v26, %v1582_v12  ;;  %v424_v32 = vsel %vm211_vm6, %v419_v29, 0.0  ;;  %v1613_v33 = vadd.f32 %v360_v24, %v328_v13 }
 0x1ad   : > { %v398_v34 = vadd.f32 %v390_v30, %v1560_v57  ;;  %v1618_v37 = vadd.f32 %v361_v25, %v329_v14  ;;  %v344_v38 = vpop.permute.xlu1 %343  ;;  %v346_v39 = vpop.permute.xlu0 %345  ;;  %v332_v24 = vadd.f32 %v324_v54, %v1499_v7  ;;  %v228_v27 = vmul.f32 %v227_v45, %v1473_v0 }
 0x1ae   : > { %v1620_v40 = vadd.f32 %v424_v32, %v399_v31  ;;  %v378_v41 = vrot.slane %v1613_v33, 7  ;;  %v411_v42 = vrot.slane %v1613_v33, 1  ;;  %v362_v43 = vsel %vm221_vm2, %v344_v38, 0.0 }
 0x1af   : > { %v431_v46 = vadd.f32 %v415_v28, %v398_v34  ;;  %v1627_v47 = vadd.f32 %v362_v43, %v330_v22  ;;  %v375_v8 = vrot.slane %v1618_v37, 7  ;;  %v408_v10 = vrot.slane %v1618_v37, 1 }
 0x1b0   : > { %v383_v49 = vsel %vm381_vm4, %v374_v35, %v378_v41  ;;  %v387_v52 = vsel %vm381_vm4, %v378_v41, %v374_v35  ;;  %v416_v53 = vsel %vm414_vm5, %v407_v36, %v411_v42  ;;  %v420_v59 = vsel %vm414_vm5, %v411_v42, %v407_v36 }
 0x1b1   : > { %v392_v55 = vsel %vm208_vm3, %v387_v52, 0.0  ;;  %v401_v56 = vadd.f32 %v383_v49, %v1613_v33  ;;  %v348_v60 = vpop.permute.xlu1 %347  ;;  %v458_v61 = vpop.permute.xlu0 %457  ;;  %v426_v63 = vsel %vm211_vm6, %v420_v59, 0.0  ;;  %v379_v51 = vrot.slane %v1627_v47, 7 }
 0x1b2   : > { %v400_v62 = vadd.f32 %v392_v55, %v1591_v19  ;;  %v412_v11 = vrot.slane %v1627_v47, 1  ;;  %v363_v13 = vsel %vm221_vm2, %v346_v39, 0.0  ;;  %v230_v28 = vmul.f32 %v227_v45, %v1475_v1 }
 0x1b3   : > { %v434_v9 = vadd.f32 %v426_v63, %v401_v56  ;;  %v384_v15 = vsel %vm381_vm4, %v375_v8, %v379_v51  ;;  %v388_v16 = vsel %vm381_vm4, %v379_v51, %v375_v8  ;;  %v1658_v17 = vadd.f32 %v363_v13, %v331_v48 }
 0x1b4   : > { %v433_v14 = vadd.f32 %v416_v53, %v400_v62  ;;  %v394_v18 = vsel %vm208_vm3, %v388_v16, 0.0  ;;  %v403_v20 = vadd.f32 %v384_v15, %v1627_v47  ;;  %v417_v21 = vsel %vm414_vm5, %v408_v10, %v412_v11 }
 0x1b5   : > { %v460_v22 = vpop.permute.xlu1 %459  ;;  %v462_v23 = vpop.permute.xlu0 %461  ;;  %v402_v25 = vadd.f32 %v394_v18, %v1618_v37  ;;  %v421_v26 = vsel %vm414_vm5, %v412_v11, %v408_v10  ;;  %v364_v30 = vsel %vm221_vm2, %v348_v60, 0.0  ;;  %v229_v31 = vmul.f32 %v227_v45, %v1481_v2 }
 0x1b6   : > { %v428_v29 = vsel %vm211_vm6, %v421_v26, 0.0  ;;  %v1680_v35 = vadd.f32 %v364_v30, %v332_v24  ;;  %v231_v36 = vmul.f32 %v227_v45, %v1483_v3  ;;  %v232_v0 = vmul.f32 %v227_v45, %v1489_v4 }
 0x1b7   : > { %v435_v32 = vadd.f32 %v417_v21, %v402_v25  ;;  %v436_v34 = vadd.f32 %v428_v29, %v403_v20  ;;  %v233_v1 = vmul.f32 %v227_v45, %v1491_v5  ;;  %v440_v38 = vstv %s1638_s8 }
 0x1b8   : > { %v1687_v42 = vmul.f32 %v227_v45, %v1497_v6  ;;  %v376_v43 = vrot.slane %v1658_v17, 7  ;;  %v380_v2 = vrot.slane %v1680_v35, 7  ;;  %v413_v48 = vrot.slane %v1680_v35, 1 }
 0x1b9   : > { %v464_v39 = vpop.permute.xlu1 %463  ;;  %v466_v41 = vpop.permute.xlu0 %465  ;;  %v235_v49 = vmul.f32 %v227_v45, %v1499_v7  ;;  %v409_v3 = vrot.slane %v1658_v17, 1  ;;  %v441_v4 = vmul.f32 %v440_v38, %v431_v46  ;;  %v442_v5 = vmul.f32 %v440_v38, %v1620_v40 }
 0x1ba   : > { %v385_v6 = vsel %vm381_vm4, %v376_v43, %v380_v2  ;;  %v389_v52 = vsel %vm381_vm4, %v380_v2, %v376_v43  ;;  %v481_v59 = vsel %vm222_vm7, %v458_v61, 0.0  ;;  %v1714_v60 = vstv %s1669_s16 }
 0x1bb   : > { %v396_v7 = vsel %vm208_vm3, %v389_v52, 0.0  ;;  %v405_v45 = vadd.f32 %v385_v6, %v1680_v35  ;;  %v418_v53 = vsel %vm414_vm5, %v409_v3, %v413_v48  ;;  %v422_v46 = vsel %vm414_vm5, %v413_v48, %v409_v3 }
 0x1bc   : > { %v404_v55 = vadd.f32 %v396_v7, %v1658_v17  ;;  %v430_v56 = vsel %vm211_vm6, %v422_v46, 0.0  ;;  %v443_v62 = vmul.f32 %v440_v38, %v433_v14  ;;  %v444_v63 = vmul.f32 %v440_v38, %v434_v9 }
 0x1bd   : > { %v468_v54 = vpop.permute.xlu1 %467  ;;  %v470_v40 = vpop.permute.xlu0 %469  ;;  %v438_v8 = vadd.f32 %v430_v56, %v405_v45  ;;  %v1717_v51 = vstv %s1677_s27  ;;  %v1719_v10 = vadd.f32 %v441_v4, %v228_v27  ;;  %v1721_v11 = vadd.f32 %v442_v5, %v229_v31 }
 0x1be   : > { %v445_v13 = vmul.f32 %v440_v38, %v435_v32  ;;  %v437_v15 = vadd.f32 %v418_v53, %v404_v55  ;;  %v446_v16 = vmul.f32 %v440_v38, %v436_v34  ;;  %v489_v18 = vadd.f32 %v481_v59, %v1560_v57 }
 0x1bf   : > { %v482_v20 = vsel %vm222_vm7, %v460_v22, 0.0  ;;  %v483_v61 = vsel %vm222_vm7, %v462_v23, 0.0  ;;  %v484_v21 = vsel %vm222_vm7, %v464_v39, 0.0  ;;  %v485_v24 = vsel %vm222_vm7, %v466_v41, 0.0 }
 0x1c0   : > { %v486_v25 = vsel %vm222_vm7, %v468_v54, 0.0  ;;  %v1738_v22 = vadd.f32 %v443_v62, %v230_v28  ;;  %v1740_v23 = vadd.f32 %v444_v63, %v231_v36  ;;  %v448_v26 = vmul.f32 %v440_v38, %v438_v8 }
 0x1c1   : > { %v472_v14 = vpop.permute.xlu1 %471  ;;  %v498_v9 = vpop.permute.xlu0 %497  ;;  %v487_v27 = vsel %vm222_vm7, %v470_v40, 0.0  ;;  %v1746_v29 = vadd.f32 %v445_v13, %v232_v0  ;;  %v490_v30 = vadd.f32 %v482_v20, %v1582_v12  ;;  %v491_v31 = vadd.f32 %v483_v61, %v1591_v19 }
 0x1c2   : > { %v521_v57 = vsel %vm223_vm8, %v498_v9, 0.0  ;;  %v1752_v28 = vadd.f32 %v446_v16, %v233_v1  ;;  %v492_v34 = vadd.f32 %v484_v21, %v1613_v33  ;;  %v493_v36 = vadd.f32 %v485_v24, %v1618_v37 }
 0x1c3   : > { %v1750_v32 = vadd.f32 %v521_v57, %v489_v18  ;;  %v494_v39 = vadd.f32 %v486_v25, %v1627_v47  ;;  %v1757_v2 = vmul.f32 %v440_v38, %v437_v15  ;;  %v1760_v0 = vadd.f32 %v487_v27, %v1658_v17 }
 0x1c4   : > { %v1766_v1 = vadd.f32 %v448_v26, %v235_v49  ;;  %v1770_v33 = vsel %vm222_vm7, %v472_v14, 0.0  ;;  %vm219_vm2 = vcmp.lt.s32.totalorder %v1563_v58, 13  ;;  %vm977_vm7 = vcmask 130048  }
 0x1c5   : > { %v500_v41 = vpop.permute.xlu1 %499  ;;  %v502_v43 = vpop.permute.xlu0 %501  ;;  %v537_v38 = vrot.slane %v1750_v32, 7  ;;  %v569_v17 = vrot.slane %v1750_v32, 1  ;;  %v601_v48 = vrot.slane %v1750_v32, 6  ;;  %v634_v3 = vrot.slane %v1750_v32, 2 }
 0x1c6   : > { %v522_v12 = vsel %vm223_vm8, %v500_v41, 0.0  ;;  %v523_v19 = vsel %vm223_vm8, %v502_v43, 0.0 }
 0x1c7   : > { %v1772_v37 = vadd.f32 %v522_v12, %v490_v30  ;;  %v1774_v47 = vadd.f32 %v523_v19, %v491_v31 }
 0x1c9   : > { %v541_v4 = vrot.slane %v1772_v37, 7  ;;  %v573_v49 = vrot.slane %v1772_v37, 1  ;;  %v605_v5 = vrot.slane %v1772_v37, 6  ;;  %v638_v6 = vrot.slane %v1772_v37, 2  ;;  %v504_v52 = vpop.permute.xlu1 %503  ;;  %v506_v7 = vpop.permute.xlu0 %505 }
 0x1ca   : > { %v538_v45 = vrot.slane %v1774_v47, 7  ;;  %v570_v53 = vrot.slane %v1774_v47, 1  ;;  %v602_v46 = vrot.slane %v1774_v47, 6  ;;  %v635_v54 = vrot.slane %v1774_v47, 2 }
 0x1cb   : > { %v545_v40 = vsel %vm381_vm4, %v537_v38, %v541_v4  ;;  %v549_v55 = vsel %vm381_vm4, %v541_v4, %v537_v38  ;;  %v577_v56 = vsel %vm414_vm5, %v569_v17, %v573_v49  ;;  %v581_v59 = vsel %vm414_vm5, %v573_v49, %v569_v17 }
 0x1cc   : > { %v553_v62 = vsel %vm208_vm3, %v549_v55, 0.0  ;;  %v562_v63 = vadd.f32 %v545_v40, %v1772_v37  ;;  %v586_v8 = vsel %vm211_vm6, %v581_v59, 0.0  ;;  %v610_v13 = vsel %vm609_vm9, %v601_v48, %v605_v5 }
 0x1cd   : > { %v561_v15 = vadd.f32 %v553_v62, %v1750_v32  ;;  %v614_v16 = vsel %vm609_vm9, %v605_v5, %v601_v48  ;;  %v643_v18 = vsel %vm642_vm10, %v634_v3, %v638_v6  ;;  %v647_v20 = vsel %vm642_vm10, %v638_v6, %v634_v3  ;;  %v508_v61 = vpop.permute.xlu1 %507  ;;  %v510_v14 = vpop.permute.xlu0 %509 }
 0x1ce   : > { %v594_v9 = vadd.f32 %v586_v8, %v562_v63  ;;  %v618_v21 = vsel %vm212_vm11, %v614_v16, 0.0  ;;  %v652_v24 = vsel %vm215_vm12, %v647_v20, 0.0  ;;  %v524_v25 = vsel %vm223_vm8, %v504_v52, 0.0 }
 0x1cf   : > { %v593_v57 = vadd.f32 %v577_v56, %v561_v15  ;;  %v1816_v26 = vadd.f32 %v524_v25, %v492_v34  ;;  %v525_v27 = vsel %vm223_vm8, %v506_v7, 0.0  ;;  %v526_v30 = vsel %vm223_vm8, %v508_v61, 0.0 }
 0x1d0   : > { %v627_v31 = vadd.f32 %v610_v13, %v594_v9  ;;  %v1822_v41 = vadd.f32 %v525_v27, %v493_v36  ;;  %v1824_v43 = vadd.f32 %v526_v30, %v494_v39  ;;  %v527_v12 = vsel %vm223_vm8, %v510_v14, 0.0 }
 0x1d1   : > { %v626_v19 = vadd.f32 %v618_v21, %v593_v57  ;;  %v542_v38 = vrot.slane %v1816_v26, 7  ;;  %v574_v34 = vrot.slane %v1816_v26, 1  ;;  %v606_v17 = vrot.slane %v1816_v26, 6  ;;  %v512_v48 = vpop.permute.xlu1 %511  ;;  %v1831_v3 = vpop.permute.xlu0 %685 }
 0x1d2   : > { %v660_v4 = vadd.f32 %v652_v24, %v627_v31  ;;  %v639_v49 = vrot.slane %v1816_v26, 2  ;;  %v539_v36 = vrot.slane %v1822_v41, 7  ;;  %v571_v39 = vrot.slane %v1822_v41, 1 }
 0x1d3   : > { %v659_v5 = vadd.f32 %v643_v18, %v626_v19  ;;  %v546_v6 = vsel %vm381_vm4, %v538_v45, %v542_v38  ;;  %v550_v52 = vsel %vm381_vm4, %v542_v38, %v538_v45  ;;  %v578_v7 = vsel %vm414_vm5, %v570_v53, %v574_v34 }
 0x1d4   : > { %v670_v40 = vmul.f32 %v1714_v60, %v660_v4  ;;  %v555_v55 = vsel %vm208_vm3, %v550_v52, 0.0  ;;  %v564_v56 = vadd.f32 %v546_v6, %v1816_v26  ;;  %v582_v59 = vsel %vm414_vm5, %v574_v34, %v570_v53 }
 0x1d5   : > { %v669_v62 = vmul.f32 %v1714_v60, %v659_v5  ;;  %v563_v63 = vadd.f32 %v555_v55, %v1774_v47  ;;  %v588_v45 = vsel %vm211_vm6, %v582_v59, 0.0  ;;  %v611_v8 = vsel %vm609_vm9, %v602_v46, %v606_v17  ;;  %v1854_v13 = vpop.permute.xlu1 %687  ;;  %v1856_v15 = vpop.permute.xlu0 %689 }
 0x1d6   : > { %v1859_v16 = vadd.f32 %v670_v40, %v1721_v11  ;;  %v596_v18 = vadd.f32 %v588_v45, %v564_v56  ;;  %v615_v53 = vsel %vm609_vm9, %v606_v17, %v602_v46  ;;  %v644_v20 = vsel %vm642_vm10, %v635_v54, %v639_v49 }
 0x1d7   : > { %v1866_v61 = vadd.f32 %v669_v62, %v1719_v10  ;;  %v595_v14 = vadd.f32 %v578_v7, %v563_v63  ;;  %v620_v9 = vsel %vm212_vm11, %v615_v53, 0.0  ;;  %v648_v21 = vsel %vm642_vm10, %v639_v49, %v635_v54 }
 0x1d8   : > { %v629_v11 = vadd.f32 %v611_v8, %v596_v18  ;;  %v654_v24 = vsel %vm215_vm12, %v648_v21, 0.0  ;;  %v603_v46 = vrot.slane %v1822_v41, 6  ;;  %v636_v25 = vrot.slane %v1822_v41, 2 }
 0x1d9   : > { %v628_v57 = vadd.f32 %v620_v9, %v595_v14  ;;  %v543_v10 = vrot.slane %v1824_v43, 7  ;;  %v575_v27 = vrot.slane %v1824_v43, 1  ;;  %v607_v30 = vrot.slane %v1824_v43, 6  ;;  %v1880_v31 = vpop.permute.xlu1 %691  ;;  %v1882_v54 = vpop.permute.xlu0 %693 }
 0x1da   : > { %v662_v19 = vadd.f32 %v654_v24, %v629_v11  ;;  %v640_v38 = vrot.slane %v1824_v43, 2  ;;  %v1886_v34 = vadd.f32 %v527_v12, %v1760_v0  ;;  %v528_v17 = vsel %vm223_vm8, %v512_v48, 0.0 }
 0x1db   : > { %v661_v4 = vadd.f32 %v644_v20, %v628_v57  ;;  %v547_v49 = vsel %vm381_vm4, %v539_v36, %v543_v10  ;;  %v551_v5 = vsel %vm381_vm4, %v543_v10, %v539_v36  ;;  %v579_v6 = vsel %vm414_vm5, %v571_v39, %v575_v27 }
 0x1dc   : > { %v672_v52 = vmul.f32 %v1714_v60, %v662_v19  ;;  %v557_v7 = vsel %vm208_vm3, %v551_v5, 0.0  ;;  %v566_v0 = vadd.f32 %v547_v49, %v1824_v43  ;;  %v583_v12 = vsel %vm414_vm5, %v575_v27, %v571_v39 }
 0x1dd   : > { %v671_v48 = vmul.f32 %v1714_v60, %v661_v4  ;;  %v565_v40 = vadd.f32 %v557_v7, %v1822_v41  ;;  %v590_v36 = vsel %vm211_vm6, %v583_v12, 0.0  ;;  %v612_v55 = vsel %vm609_vm9, %v603_v46, %v607_v30  ;;  %v696_v56 = vpop.permute.xlu1 %695  ;;  %v1908_v59 = vpop.permute.xlu0 %697 }
 0x1de   : > { %v1911_v62 = vadd.f32 %v672_v52, %v1740_v23  ;;  %v598_v63 = vadd.f32 %v590_v36, %v566_v0  ;;  %v616_v39 = vsel %vm609_vm9, %v607_v30, %v603_v46  ;;  %v645_v45 = vsel %vm642_vm10, %v636_v25, %v640_v38 }
 0x1df   : > { %v496_v8 = vadd.f32 %v1770_v33, %v1680_v35  ;;  %v1920_v18 = vadd.f32 %v671_v48, %v1738_v22  ;;  %v597_v53 = vadd.f32 %v579_v6, %v565_v40  ;;  %v649_v20 = vsel %vm642_vm10, %v640_v38, %v636_v25 }
 0x1e0   : > { %v1926_v23 = vadd.f32 %v1757_v2, %v1687_v42  ;;  %v622_v14 = vsel %vm212_vm11, %v616_v39, 0.0  ;;  %v631_v9 = vadd.f32 %v612_v55, %v598_v63  ;;  %v656_v21 = vsel %vm215_vm12, %v649_v20, 0.0 }
 0x1e1   : > { %v630_v11 = vadd.f32 %v622_v14, %v597_v53  ;;  %v540_v35 = vrot.slane %v1886_v34, 7  ;;  %v572_v22 = vrot.slane %v1886_v34, 1  ;;  %v1934_v33 = vadd.f32 %v528_v17, %v496_v8  ;;  %v700_v24 = vpop.permute.xlu1 %699  ;;  %v726_v46 = vpop.permute.xlu0 %725 }
 0x1e2   : > { %v664_v42 = vadd.f32 %v656_v21, %v631_v9  ;;  %v604_v2 = vrot.slane %v1886_v34, 6  ;;  %v637_v25 = vrot.slane %v1886_v34, 2  ;;  %v709_v57 = vsel %vm224_vm13, %v1831_v3, 0.0 }
 0x1e3   : > { %v663_v10 = vadd.f32 %v645_v45, %v630_v11  ;;  %v544_v27 = vrot.slane %v1934_v33, 7  ;;  %v576_v30 = vrot.slane %v1934_v33, 1  ;;  %v608_v19 = vrot.slane %v1934_v33, 6 }
 0x1e4   : > { %v674_v38 = vmul.f32 %v1714_v60, %v664_v42  ;;  %v641_v17 = vrot.slane %v1934_v33, 2  ;;  %v710_v4 = vsel %vm224_vm13, %v1854_v13, 0.0  ;;  %v711_v49 = vsel %vm224_vm13, %v1856_v15, 0.0 }
 0x1e5   : > { %v673_v3 = vmul.f32 %v1714_v60, %v663_v10  ;;  %v548_v5 = vsel %vm381_vm4, %v540_v35, %v544_v27  ;;  %v552_v6 = vsel %vm381_vm4, %v544_v27, %v540_v35  ;;  %v580_v52 = vsel %vm414_vm5, %v572_v22, %v576_v30  ;;  %v728_v7 = vpop.permute.xlu1 %727  ;;  %v730_v0 = vpop.permute.xlu0 %729 }
 0x1e6   : > { %v1961_v12 = vadd.f32 %v674_v38, %v1752_v28  ;;  %v559_v13 = vsel %vm208_vm3, %v552_v6, 0.0  ;;  %v568_v15 = vadd.f32 %v548_v5, %v1934_v33  ;;  %v584_v48 = vsel %vm414_vm5, %v576_v30, %v572_v22 }
 0x1e7   : > { %v1969_v40 = vadd.f32 %v673_v3, %v1746_v29  ;;  %v567_v36 = vadd.f32 %v559_v13, %v1886_v34  ;;  %v592_v55 = vsel %vm211_vm6, %v584_v48, 0.0  ;;  %v613_v28 = vsel %vm609_vm9, %v604_v2, %v608_v19 }
 0x1e8   : > { %v600_v63 = vadd.f32 %v592_v55, %v568_v15  ;;  %v617_v39 = vsel %vm609_vm9, %v608_v19, %v604_v2  ;;  %v646_v45 = vsel %vm642_vm10, %v637_v25, %v641_v17  ;;  %v650_v8 = vsel %vm642_vm10, %v641_v17, %v637_v25 }
 0x1e9   : > { %v599_v29 = vadd.f32 %v580_v52, %v567_v36  ;;  %v624_v53 = vsel %vm212_vm11, %v617_v39, 0.0  ;;  %v717_v20 = vadd.f32 %v709_v57, %v1750_v32  ;;  %v718_v14 = vadd.f32 %v710_v4, %v1772_v37  ;;  %v732_v9 = vpop.permute.xlu1 %731  ;;  %v734_v21 = vpop.permute.xlu0 %733 }
 0x1ea   : > { %v633_v11 = vadd.f32 %v613_v28, %v600_v63  ;;  %v712_v35 = vsel %vm224_vm13, %v1880_v31, 0.0  ;;  %v713_v22 = vsel %vm224_vm13, %v1882_v54, 0.0  ;;  %v714_v42 = vsel %vm224_vm13, %v696_v56, 0.0 }
 0x1eb   : > { %v632_v2 = vadd.f32 %v624_v53, %v599_v29  ;;  %v658_v32 = vsel %vm215_vm12, %v650_v8, 0.0  ;;  %v719_v37 = vadd.f32 %v711_v49, %v1774_v47  ;;  %v720_v25 = vadd.f32 %v712_v35, %v1816_v26 }
 0x1ec   : > { %v666_v57 = vadd.f32 %v658_v32, %v633_v11  ;;  %v1999_v10 = vadd.f32 %v713_v22, %v1822_v41  ;;  %v715_v31 = vsel %vm224_vm13, %v1908_v59, 0.0  ;;  %v749_v54 = vsel %vm225_vm14, %v726_v46, 0.0 }
 0x1ed   : > { %v665_v56 = vadd.f32 %v646_v45, %v632_v2  ;;  %v2007_v27 = vadd.f32 %v714_v42, %v1824_v43  ;;  %v2011_v47 = vsel %vm224_vm13, %v700_v24, 0.0  ;;  %v757_v26 = vadd.f32 %v749_v54, %v717_v20  ;;  %v736_v38 = vpop.permute.xlu1 %735  ;;  %v738_v17 = vpop.permute.xlu0 %737 }
 0x1ee   : > { %v676_v41 = vmul.f32 %v1714_v60, %v666_v57  ;;  %v2016_v30 = vadd.f32 %v715_v31, %v1886_v34  ;;  %v750_v59 = vsel %vm225_vm14, %v728_v7, 0.0  ;;  %v751_v43 = vsel %vm225_vm14, %v730_v0, 0.0 }
 0x1ef   : > { %v675_v46 = vmul.f32 %v1714_v60, %v665_v56  ;;  %v765_v24 = vrot.slane %v757_v26, 7  ;;  %v797_v19 = vrot.slane %v757_v26, 1  ;;  %v752_v34 = vsel %vm225_vm14, %v732_v9, 0.0 }
 0x1f0   : > { %v2029_v4 = vadd.f32 %v676_v41, %v1766_v1  ;;  %v829_v49 = vrot.slane %v757_v26, 6  ;;  %v861_v3 = vrot.slane %v757_v26, 2  ;;  %v893_v5 = vrot.slane %v757_v26, 5 }
 0x1f1   : > { %v2032_v6 = vadd.f32 %v675_v46, %v1926_v23  ;;  %v926_v60 = vrot.slane %v757_v26, 3  ;;  %v758_v52 = vadd.f32 %v750_v59, %v718_v14  ;;  %v2034_v7 = vadd.f32 %v751_v43, %v719_v37 }
 0x1f2   : > { %v2036_v0 = vadd.f32 %v752_v34, %v720_v25  ;;  %v2040_v13 = vsel %vm225_vm14, %v734_v21, 0.0  ;;  %v2044_v1 = vsel %vm225_vm14, %v736_v38, 0.0  ;;  %v2048_v15 = vsel %vm225_vm14, %v738_v17, 0.0 }
 0x1f3   : > { %v769_v23 = vrot.slane %v758_v52, 7  ;;  %v801_v48 = vrot.slane %v758_v52, 1  ;;  %v833_v36 = vrot.slane %v758_v52, 6  ;;  %v865_v55 = vrot.slane %v758_v52, 2 }
 0x1f4   : > { %v897_v28 = vrot.slane %v758_v52, 5  ;;  %v930_v63 = vrot.slane %v758_v52, 3  ;;  %v766_v39 = vrot.slane %v2034_v7, 7  ;;  %v798_v45 = vrot.slane %v2034_v7, 1 }
 0x1f5   : > { %v773_v8 = vsel %vm381_vm4, %v765_v24, %v769_v23  ;;  %v777_v29 = vsel %vm381_vm4, %v769_v23, %v765_v24  ;;  %v805_v53 = vsel %vm414_vm5, %v797_v19, %v801_v48  ;;  %v809_v20 = vsel %vm414_vm5, %v801_v48, %v797_v19 }
 0x1f6   : > { %v781_v14 = vsel %vm208_vm3, %v777_v29, 0.0  ;;  %v790_v9 = vadd.f32 %v773_v8, %v758_v52  ;;  %v814_v21 = vsel %vm211_vm6, %v809_v20, 0.0  ;;  %v837_v11 = vsel %vm609_vm9, %v829_v49, %v833_v36 }
 0x1f7   : > { %v789_v35 = vadd.f32 %v781_v14, %v757_v26  ;;  %v841_v22 = vsel %vm609_vm9, %v833_v36, %v829_v49  ;;  %v869_v42 = vsel %vm642_vm10, %v861_v3, %v865_v55  ;;  %v873_v2 = vsel %vm642_vm10, %v865_v55, %v861_v3 }
 0x1f8   : > { %v822_v32 = vadd.f32 %v814_v21, %v790_v9  ;;  %v845_v37 = vsel %vm212_vm11, %v841_v22, 0.0  ;;  %v878_v25 = vsel %vm215_vm12, %v873_v2, 0.0  ;;  %v902_v57 = vsel %vm901_vm15, %v893_v5, %v897_v28 }
 0x1f9   : > { %v821_v31 = vadd.f32 %v805_v53, %v789_v35  ;;  %v906_v54 = vsel %vm901_vm15, %v897_v28, %v893_v5  ;;  %v935_v56 = vsel %vm934_vm0, %v926_v60, %v930_v63  ;;  %v939_v26 = vsel %vm934_vm0, %v930_v63, %v926_v60 }
 0x1fa   : > { %v854_v41 = vadd.f32 %v837_v11, %v822_v32  ;;  %v910_v59 = vsel %vm216_vm1, %v906_v54, 0.0  ;;  %v944_v43 = vsel %vm219_vm2, %v939_v26, 0.0  ;;  %v830_v46 = vrot.slane %v2034_v7, 6 }
 0x1fb   : > { %v853_v24 = vadd.f32 %v845_v37, %v821_v31  ;;  %v862_v19 = vrot.slane %v2034_v7, 2  ;;  %v894_v34 = vrot.slane %v2034_v7, 5  ;;  %v927_v38 = vrot.slane %v2034_v7, 3  ;;  %v740_v31 = vpop.permute.xlu1 %739 }
 0x1fc   : > { %v886_v17 = vadd.f32 %v878_v25, %v854_v41  ;;  %v770_v49 = vrot.slane %v2036_v0, 7  ;;  %v802_v3 = vrot.slane %v2036_v0, 1  ;;  %v834_v5 = vrot.slane %v2036_v0, 6 }
 0x1fd   : > { %v885_v60 = vadd.f32 %v869_v42, %v853_v24  ;;  %v866_v52 = vrot.slane %v2036_v0, 2  ;;  %v898_v23 = vrot.slane %v2036_v0, 5  ;;  %v931_v48 = vrot.slane %v2036_v0, 3 }
 0x1fe   : > { %v919_v36 = vadd.f32 %v902_v57, %v886_v17  ;;  %v774_v55 = vsel %vm381_vm4, %v766_v39, %v770_v49  ;;  %v778_v28 = vsel %vm381_vm4, %v770_v49, %v766_v39  ;;  %v806_v63 = vsel %vm414_vm5, %v798_v45, %v802_v3 }
 0x1ff   : > { %v918_v8 = vadd.f32 %v910_v59, %v885_v60  ;;  %v783_v29 = vsel %vm208_vm3, %v778_v28, 0.0  ;;  %v792_v53 = vadd.f32 %v774_v55, %v2036_v0  ;;  %v810_v20 = vsel %vm414_vm5, %v802_v3, %v798_v45 }
 0x200   : > { %v952_v14 = vadd.f32 %v944_v43, %v919_v36  ;;  %v791_v9 = vadd.f32 %v783_v29, %v2034_v7  ;;  %v816_v21 = vsel %vm211_vm6, %v810_v20, 0.0  ;;  %v838_v39 = vsel %vm609_vm9, %v830_v46, %v834_v5 }
 0x201   : > { %v951_v11 = vadd.f32 %v935_v56, %v918_v8  ;;  %v824_v35 = vadd.f32 %v816_v21, %v792_v53  ;;  %v842_v22 = vsel %vm609_vm9, %v834_v5, %v830_v46  ;;  %v870_v0 = vsel %vm642_vm10, %v862_v19, %v866_v52 }
 0x202   : > { %v962_v42 = vmul.f32 %v1717_v51, %v952_v14  ;;  %v823_v45 = vadd.f32 %v806_v63, %v791_v9  ;;  %v847_v7 = vsel %vm212_vm11, %v842_v22, 0.0  ;;  %v874_v2 = vsel %vm642_vm10, %v866_v52, %v862_v19 }
 0x203   : > { %v961_v32 = vmul.f32 %v1717_v51, %v951_v11  ;;  %v856_v37 = vadd.f32 %v838_v39, %v824_v35  ;;  %v880_v25 = vsel %vm215_vm12, %v874_v2, 0.0  ;;  %v903_v57 = vsel %vm901_vm15, %v894_v34, %v898_v23 }
 0x204   : > { %v970_v54 = vadd.f32 %v962_v42, %v1859_v16  ;;  %v855_v56 = vadd.f32 %v847_v7, %v823_v45  ;;  %v907_v26 = vsel %vm901_vm15, %v898_v23, %v894_v34  ;;  %v936_v41 = vsel %vm934_vm0, %v927_v38, %v931_v48 }
 0x205   : > { %v724_v59 = vadd.f32 %v2011_v47, %v1934_v33  ;;  %v969_v43 = vadd.f32 %v961_v32, %v1866_v61  ;;  %v888_v46 = vadd.f32 %v880_v25, %v856_v37  ;;  %v940_v24 = vsel %vm934_vm0, %v931_v48, %v927_v38 }
 0x206   : > { %979 = vst.msk [vmem:[%s2140_s28 + $0x8] sm:$0xff] %vm977_vm7, %v970_v54  ;;  %v887_v16 = vadd.f32 %v870_v0, %v855_v56  ;;  %v761_v19 = vadd.f32 %v2040_v13, %v1999_v10  ;;  %v762_v33 = vadd.f32 %v2044_v1, %v2007_v27  ;;  %v756_v61 = vsel %vm225_vm14, %v740_v31, 0.0 }
 0x207   : > { %978 = vst.msk [vmem:[%s2140_s28] sm:$0xff] %vm977_vm7, %v969_v43  ;;  %v912_v47 = vsel %vm216_vm1, %v907_v26, 0.0  ;;  %v921_v34 = vadd.f32 %v903_v57, %v888_v46  ;;  %v946_v38 = vsel %vm219_vm2, %v940_v24, 0.0  ;;  %v2158_v17 = vadd.f32 %v2048_v15, %v2016_v30 }
 0x208   : > { %v920_v10 = vadd.f32 %v912_v47, %v887_v16  ;;  %v767_v13 = vrot.slane %v761_v19, 7  ;;  %v799_v49 = vrot.slane %v761_v19, 1  ;;  %v831_v27 = vrot.slane %v761_v19, 6 }
 0x209   : > { %v954_v1 = vadd.f32 %v946_v38, %v921_v34  ;;  %v863_v44 = vrot.slane %v761_v19, 2  ;;  %v895_v3 = vrot.slane %v761_v19, 5  ;;  %v928_v5 = vrot.slane %v761_v19, 3 }
 0x20a   : > { %v953_v60 = vadd.f32 %v936_v41, %v920_v10  ;;  %v771_v52 = vrot.slane %v762_v33, 7  ;;  %v803_v23 = vrot.slane %v762_v33, 1  ;;  %v835_v48 = vrot.slane %v762_v33, 6 }
 0x20b   : > { %v964_v36 = vmul.f32 %v1717_v51, %v954_v1  ;;  %v867_v55 = vrot.slane %v762_v33, 2  ;;  %v899_v28 = vrot.slane %v762_v33, 5  ;;  %v932_v63 = vrot.slane %v762_v33, 3 }
 0x20c   : > { %v963_v30 = vmul.f32 %v1717_v51, %v953_v60  ;;  %v775_v15 = vsel %vm381_vm4, %v767_v13, %v771_v52  ;;  %v779_v8 = vsel %vm381_vm4, %v771_v52, %v767_v13  ;;  %v807_v29 = vsel %vm414_vm5, %v799_v49, %v803_v23 }
 0x20d   : > { %v972_v53 = vadd.f32 %v964_v36, %v1911_v62  ;;  %v785_v20 = vsel %vm208_vm3, %v779_v8, 0.0  ;;  %v794_v14 = vadd.f32 %v775_v15, %v762_v33  ;;  %v811_v9 = vsel %vm414_vm5, %v803_v23, %v799_v49 }
 0x20e   : > { %v971_v21 = vadd.f32 %v963_v30, %v1920_v18  ;;  %v793_v39 = vadd.f32 %v785_v20, %v761_v19  ;;  %v818_v11 = vsel %vm211_vm6, %v811_v9, 0.0  ;;  %v839_v35 = vsel %vm609_vm9, %v831_v27, %v835_v48 }
 0x20f   : > { %981 = vst.msk [vmem:[%s2140_s28 + $0x18] sm:$0xff] %vm977_vm7, %v972_v53  ;;  %v826_v22 = vadd.f32 %v818_v11, %v794_v14  ;;  %v843_v62 = vsel %vm609_vm9, %v835_v48, %v831_v27  ;;  %v871_v0 = vsel %vm642_vm10, %v863_v44, %v867_v55  ;;  %v875_v42 = vsel %vm642_vm10, %v867_v55, %v863_v44 }
 0x210   : > { %980 = vst.msk [vmem:[%s2140_s28 + $0x10] sm:$0xff] %vm977_vm7, %v971_v21  ;;  %v825_v18 = vadd.f32 %v807_v29, %v793_v39  ;;  %v849_v45 = vsel %vm212_vm11, %v843_v62, 0.0  ;;  %v904_v7 = vsel %vm901_vm15, %v895_v3, %v899_v28  ;;  %v764_v2 = vadd.f32 %v756_v61, %v724_v59 }
 0x211   : > { %v858_v32 = vadd.f32 %v839_v35, %v826_v22  ;;  %v908_v37 = vsel %vm901_vm15, %v899_v28, %v895_v3  ;;  %v937_v25 = vsel %vm934_vm0, %v928_v5, %v932_v63  ;;  %v941_v57 = vsel %vm934_vm0, %v932_v63, %v928_v5 }
 0x212   : > { %v857_v31 = vadd.f32 %v849_v45, %v825_v18  ;;  %v882_v54 = vsel %vm215_vm12, %v875_v42, 0.0  ;;  %v914_v56 = vsel %vm216_vm1, %v908_v37, 0.0  ;;  %v948_v26 = vsel %vm219_vm2, %v941_v57, 0.0 }
 0x213   : > { %v890_v41 = vadd.f32 %v882_v54, %v858_v32  ;;  %v768_v59 = vrot.slane %v2158_v17, 7  ;;  %v800_v43 = vrot.slane %v2158_v17, 1  ;;  %v832_v46 = vrot.slane %v2158_v17, 6 }
 0x214   : > { %v889_v24 = vadd.f32 %v871_v0, %v857_v31  ;;  %v864_v16 = vrot.slane %v2158_v17, 2  ;;  %v896_v19 = vrot.slane %v2158_v17, 5  ;;  %v772_v33 = vrot.slane %v764_v2, 7 }
 0x215   : > { %v923_v61 = vadd.f32 %v904_v7, %v890_v41  ;;  %v804_v47 = vrot.slane %v764_v2, 1  ;;  %v836_v34 = vrot.slane %v764_v2, 6  ;;  %v868_v38 = vrot.slane %v764_v2, 2 }
 0x216   : > { %v922_v10 = vadd.f32 %v914_v56, %v889_v24  ;;  %v776_v13 = vsel %vm381_vm4, %v768_v59, %v772_v33  ;;  %v780_v49 = vsel %vm381_vm4, %v772_v33, %v768_v59  ;;  %v900_v27 = vrot.slane %v764_v2, 5 }
 0x217   : > { %v956_v1 = vadd.f32 %v948_v26, %v923_v61  ;;  %v787_v44 = vsel %vm208_vm3, %v780_v49, 0.0  ;;  %v796_v3 = vadd.f32 %v776_v13, %v764_v2  ;;  %v808_v5 = vsel %vm414_vm5, %v800_v43, %v804_v47 }
 0x218   : > { %v955_v60 = vadd.f32 %v937_v25, %v922_v10  ;;  %v795_v52 = vadd.f32 %v787_v44, %v2158_v17  ;;  %v812_v23 = vsel %vm414_vm5, %v804_v47, %v800_v43  ;;  %v840_v48 = vsel %vm609_vm9, %v832_v46, %v836_v34 }
 0x219   : > { %v966_v36 = vmul.f32 %v1717_v51, %v956_v1  ;;  %v820_v55 = vsel %vm211_vm6, %v812_v23, 0.0  ;;  %v844_v28 = vsel %vm609_vm9, %v836_v34, %v832_v46  ;;  %v872_v63 = vsel %vm642_vm10, %v864_v16, %v868_v38 }
 0x21a   : > { %v965_v30 = vmul.f32 %v1717_v51, %v955_v60  ;;  %v827_v15 = vadd.f32 %v808_v5, %v795_v52  ;;  %v828_v8 = vadd.f32 %v820_v55, %v796_v3  ;;  %v851_v29 = vsel %vm212_vm11, %v844_v28, 0.0 }
 0x21b   : > { %v974_v53 = vadd.f32 %v966_v36, %v1961_v12  ;;  %v876_v20 = vsel %vm642_vm10, %v868_v38, %v864_v16  ;;  %v905_v14 = vsel %vm901_vm15, %v896_v19, %v900_v27  ;;  %v909_v9 = vsel %vm901_vm15, %v900_v27, %v896_v19 }
 0x21c   : > { %v973_v21 = vadd.f32 %v965_v30, %v1969_v40  ;;  %v859_v39 = vadd.f32 %v851_v29, %v827_v15  ;;  %v860_v11 = vadd.f32 %v840_v48, %v828_v8  ;;  %v929_v35 = vrot.slane %v2158_v17, 3 }
 0x21d   : > { %983 = vst.msk [vmem:[%s2140_s28 + $0x28] sm:$0xff] %vm977_vm7, %v974_v53  ;;  %v884_v12 = vsel %vm215_vm12, %v876_v20, 0.0  ;;  %v933_v22 = vrot.slane %v764_v2, 3  ;;  %v916_v42 = vsel %vm216_vm1, %v909_v9, 0.0 }
 0x21e   : > { %982 = vst.msk [vmem:[%s2140_s28 + $0x20] sm:$0xff] %vm977_vm7, %v973_v21  ;;  %v891_v62 = vadd.f32 %v872_v63, %v859_v39  ;;  %v892_v0 = vadd.f32 %v884_v12, %v860_v11 }
 0x21f   : > { %v938_v40 = vsel %vm934_vm0, %v929_v35, %v933_v22  ;;  %v942_v18 = vsel %vm934_vm0, %v933_v22, %v929_v35 }
 0x220   : > { %v924_v17 = vadd.f32 %v916_v42, %v891_v62  ;;  %v925_v45 = vadd.f32 %v905_v14, %v892_v0  ;;  %v950_v7 = vsel %vm219_vm2, %v942_v18, 0.0 }
 0x222   : > { %v957_v2 = vadd.f32 %v938_v40, %v924_v17  ;;  %v958_v32 = vadd.f32 %v950_v7, %v925_v45 }
 0x224   : > { %v967_v37 = vmul.f32 %v1717_v51, %v957_v2  ;;  %v968_v25 = vmul.f32 %v1717_v51, %v958_v32 }
 0x226   : > { %v975_v50 = vadd.f32 %v967_v37, %v2032_v6  ;;  %v976_v58 = vadd.f32 %v968_v25, %v2029_v4 }
 0x228   : > { %984 = vst.msk [vmem:[%s2140_s28 + $0x30] sm:$0xff] %vm977_vm7, %v975_v50  ;;  %985 = vst.msk [vmem:[%s2140_s28 + $0x38] sm:$0xff] %vm977_vm7, %v976_v58 }
 0x229   : > { %1260 = shalt.err (!%p1257_p5)
}
 0x22a   : > { %s1261_s3 = scalar_lea.hbm %s2262_s30, 1024  ;;  %s1265_s6 = scalar_lea.hbm %s2320_s2, 2048 }
 0x22b   : > { %p1262_p10 = scmp.ne.s32.totalorder %s2262_s30, %s1261_s3  ;;  %p1266_p0 = scmp.lt.s32.totalorder %s2262_s30, %s2320_s2 }
 0x22c   : > { %p1267_p4 = scmp.lt.s32.totalorder %s1265_s6, %s1261_s3 }
 0x22d   : > { %p1263_p11 = pnand %p1262_p10, %p1410_p8 }
 0x22e   : > { %p1268_p6 = por %p1267_p4, %p1266_p0 }
 0x22f   : > { %p1264_p1 = pneg %p1263_p11 }
 0x231   : > { %p1269_p3 = pnand %p1268_p6, %p1264_p1 }
 0x233   : > { %1272 = shalt.err (!%p1269_p3)
}
 0x234   : > { %s1345_s16 = smov 128   ;;  %s1346_s27 = smov 8  }
 0x235   : > { %1130 = dma.vmem_to_hbm [thread:$0]  (%p1410_p8), %s2264_s26, 1024, %s2262_s30, %s987_s12, %s1345_s16, %s1345_s16, %s1346_s27  }
 0x236 PF: > { %s1018_s28 = sand.u32 1, %s1311_s9   ;;  %p2329_p7 = scmp.ne.s32.totalorder %s2325_s21, 0 }
 0x237   : > { %p2330_p9 = scmp.ge.s32.totalorder %s1331_s14, 2  ;;  %s1019_s29 = scalar_lea.sflag [#allocation4], %s1018_s28 }
 0x239   : > { %p1141_p12 = pnand %p2330_p9, %p2329_p7 }
 0x23b   : > { %p1142_p13 = pneg %p1141_p12 }
 0x23d   : > { %1306 = dma.done.wait (%p1142_p13), %s1019_s29, 1024  }
 0x23e   : > { %1308 = vsyncadd (%p1142_p13), %s1019_s29, 4294966272  ;;  %s19_s14 = sadd.s32 1, %s1331_s14   ;;  %s2331_s9 = smov %s1315_s10 }
 0x23f   : > { %p16_p2 = scmp.ge.s32.totalorder %s19_s14, 4   ;;  %s2332_s10 = smov %s1319_s11 }
 0x240   : > { %s2333_s11 = smov %s1450_s15  ;;  %s2334_s12 = smov %s1327_s13 }
 0x241   : > { %s2335_s13 = smov %s2337_s25  ;;  %18 = sbr.rel (!%p16_p2) target bundleno = 9 (0x9), region = 78 }
 0x246   :  { %1024 = vsyncpa [#allocation3], 1 }
 0x247   :  { %1026 = vsyncpa [#allocation3 + $0x1], 1 }
 0x248   :  { %1027 = vsyncpa [#allocation4], 1 }
 0x249   :  { %1029 = vsyncpa [#allocation4 + $0x1], 1 }
 0x24a   :  { %1030 = vsyncpa [#allocation5], 1 }
 0x24b   :  { %1032 = vsyncpa [#allocation5 + $0x1], 1 }

</bundles_post_ra>
